<compile_context>
chip_gen: v7x
topology: tpu7x:2x2x1
jax: 0.10.0
libtpu: 0.0.40
codegen_flags: <defaults>
</compile_context>

<pallas_src>
import functools

import jax
import jax.numpy as jnp
from jax.experimental import pallas as pl
from jax.experimental.pallas import tpu as pltpu

# ---- "args" config of the original module ----------------------------------------
LATDIM = 128      # args.latdim
GNN_LAYER = 2     # args.gnn_layer
LN_EPS = 1e-5     # PyTorch nn.LayerNorm default

# Pipeline depth for the streamed adjacency tiles (tiled path).  Default 2 = standard
# double buffering; on 128-MiB-VMEM parts (v5e/v6e) 3 can help hide HBM jitter.
ADJ_BUFFER_COUNT = 2


# --------------------------------------------------------------------------- helpers
def _vmem_capacity_bytes() -> int:
    try:
        return int(pltpu.get_tpu_info().vmem_capacity_bytes)
    except Exception:  # conservative fallback = v7x per-TensorCore VMEM
        return 64 << 20


def _pad_to(n: int, m: int) -> int:
    return ((n + m - 1) // m) * m


def _layernorm_f32(x, eps):
    """LayerNorm over the last dim, no affine.  E[x^2] - (E[x])^2 form so the two
    lane reductions are data-independent and can pipeline on the XLU."""
    x = x.astype(jnp.float32)
    mean = jnp.mean(x, axis=-1, keepdims=True)
    mean_sq = jnp.mean(x * x, axis=-1, keepdims=True)
    var = jnp.maximum(mean_sq - mean * mean, 0.0)
    return (x - mean) * jax.lax.rsqrt(var + eps)


def _choose_tiles(n: int, max_tile: int):
    """Padded size and (tm, tk) row/contraction tiles (all (8,128)-aligned)."""
    n_pad = _pad_to(n, 128)
    if n_pad <= max_tile:
        return n_pad, n_pad, n_pad                  # single block
    n_pad = _pad_to(n_pad, 256)
    for t in (1024, 512, 256, 128):
        if t <= max_tile and n_pad % t == 0:
            return n_pad, t, t
    return n_pad, 128, 128                          # n_pad is a multiple of 128


def _resident_need_bytes(n: int, d: int) -> int:
    return (2 * n * n * 2                 # bf16 adjacency (assume pipeline 2x buffers)
            + 2 * n * d * (2 + 4)         # bf16 h0 in, f32 layer sum out
            + n * d * (2 + 4 + 4)         # in-kernel cur / layer result / running sum
            + (8 << 20))                  # Mosaic internal scratch headroom


def _tiled_need_bytes(tm: int, tk: int, d: int, nbuf: int) -> int:
    return (nbuf * tm * tk * 2            # bf16 adjacency tiles
            + 2 * tk * d * 2              # bf16 h_prev tiles
            + 2 * tm * d * 2              # bf16 h_out tiles
            + 4 * tm * d * 4              # f32 acc in/out tiles
            + tm * d * 4                  # f32 accumulator scratch
            + (4 << 20))                  # headroom


def _vmem_limit(need: int, vmem_cap: int) -> int:
    return int(min(max(need, 32 << 20), (3 * vmem_cap) // 4))


# --------------------------------------------------------------------------- kernels
def _ln_kernel(x_ref, o_ref, *, eps):
    # Blockwise LayerNorm; output dtype is bf16 for the propagation paths, f32 for L=0.
    o_ref[...] = _layernorm_f32(x_ref[...], eps).astype(o_ref.dtype)


def _resident_kernel(adj_ref, h_ref, out_ref, *, gnn_layer):
    # Whole bf16 adjacency + bf16 h resident in VMEM; layered propagation with f32
    # accumulation (identical numerics to the tiled path).
    adj = adj_ref[...]                               # bf16, no in-kernel cast
    cur = h_ref[...]                                 # bf16
    acc = None
    for _ in range(gnn_layer):
        nxt = jnp.dot(adj, cur, preferred_element_type=jnp.float32)
        acc = nxt if acc is None else acc + nxt
        cur = nxt.astype(jnp.bfloat16)
    out_ref[...] = acc


def _layer_kernel(adj_ref, h_ref, acc_in_ref, h_out_ref, acc_out_ref, acc_vmem):
    # One propagation layer: grid = (row blocks i, contraction blocks k), k last.
    # Only a (tm, 128) f32 accumulator lives in VMEM; h / layer-sum stream via HBM.
    k = pl.program_id(1)

    @pl.when(k == 0)
    def _init():
        acc_vmem[...] = jnp.zeros_like(acc_vmem)

    acc_vmem[...] += jnp.dot(adj_ref[...], h_ref[...],
                             preferred_element_type=jnp.float32)

    @pl.when(k == pl.num_programs(1) - 1)
    def _finalize():
        h_out_ref[...] = acc_vmem[...].astype(h_out_ref.dtype)
        acc_out_ref[...] = acc_in_ref[...] + acc_vmem[...]   # in-place via aliasing


# --------------------------------------------------------------------------- wrappers
def _layernorm_call(x, tm, out_dtype):
    n, d = x.shape
    out_bytes = n * d * jnp.dtype(out_dtype).itemsize
    return pl.pallas_call(
        functools.partial(_ln_kernel, eps=LN_EPS),
        out_shape=jax.ShapeDtypeStruct((n, d), out_dtype),
        grid=(n // tm,),
        in_specs=[pl.BlockSpec((tm, d), lambda i: (i, 0))],
        out_specs=pl.BlockSpec((tm, d), lambda i: (i, 0)),
        compiler_params=pltpu.CompilerParams(dimension_semantics=("parallel",)),
        cost_estimate=pl.CostEstimate(flops=8 * n * d, transcendentals=n,
                                      bytes_accessed=4 * n * d + out_bytes),
    )(x)


def _resident_call(adj_bf, h_bf, gnn_layer, vmem_cap):
    n, d = h_bf.shape
    limit = _vmem_limit(_resident_need_bytes(n, d), vmem_cap)
    return pl.pallas_call(
        functools.partial(_resident_kernel, gnn_layer=gnn_layer),
        out_shape=jax.ShapeDtypeStruct((n, d), jnp.float32),
        in_specs=[pl.BlockSpec((n, n), lambda: (0, 0)),
                  pl.BlockSpec((n, d), lambda: (0, 0))],
        out_specs=pl.BlockSpec((n, d), lambda: (0, 0)),
        compiler_params=pltpu.CompilerParams(vmem_limit_bytes=limit),
        cost_estimate=pl.CostEstimate(
            flops=2 * gnn_layer * n * n * d,
            transcendentals=0,
            bytes_accessed=2 * n * n + n * d * (2 + 4)),
    )(adj_bf, h_bf)


def _layer_call(adj_bf, h_bf, acc, tm, tk, vmem_cap, adj_buffer_count):
    n, d = h_bf.shape
    nbuf = max(2, int(adj_buffer_count))
    limit = _vmem_limit(_tiled_need_bytes(tm, tk, d, nbuf), vmem_cap)

    adj_spec = pl.BlockSpec((tm, tk), lambda i, k: (i, k))
    if nbuf > 2:  # optional deeper pipelining knob (v5e/v6e with VMEM slack)
        adj_spec = pl.BlockSpec((tm, tk), lambda i, k: (i, k),
                                pipeline_mode=pl.Buffered(nbuf))

    return pl.pallas_call(
        _layer_kernel,
        out_shape=(jax.ShapeDtypeStruct((n, d), jnp.bfloat16),   # h_{l}
                   jax.ShapeDtypeStruct((n, d), jnp.float32)),   # running layer sum
        grid_spec=pltpu.PrefetchScalarGridSpec(
            num_scalar_prefetch=0,
            grid=(n // tm, n // tk),
            in_specs=[adj_spec,                                        # adj tile
                      pl.BlockSpec((tk, d), lambda i, k: (k, 0)),      # h_{l-1} tile
                      pl.BlockSpec((tm, d), lambda i, k: (i, 0))],     # sum_in tile
            out_specs=[pl.BlockSpec((tm, d), lambda i, k: (i, 0)),     # h_l tile
                       pl.BlockSpec((tm, d), lambda i, k: (i, 0))],    # sum_out tile
            scratch_shapes=[pltpu.VMEM((tm, d), jnp.float32)]),
        input_output_aliases={2: 1},      # accumulate the layer sum in place
        compiler_params=pltpu.CompilerParams(
            dimension_semantics=("parallel", "arbitrary"),
            vmem_limit_bytes=limit),
        cost_estimate=pl.CostEstimate(
            flops=2 * n * n * d,
            transcendentals=0,
            bytes_accessed=2 * n * n + (n // tm) * n * d * 2 + n * d * (2 + 8)),
    )(adj_bf, h_bf, acc)


def topo_encoder(adj, embeds, gnn_layer=GNN_LAYER, *, force_tiled=False,
                 max_tile=1024, adj_buffer_count=ADJ_BUFFER_COUNT):
    n, d = embeds.shape
    assert adj.shape == (n, n)
    vmem_cap = _vmem_capacity_bytes()
    budget = (3 * vmem_cap) // 4
    n_pad, tm, tk = _choose_tiles(n, max(128, int(max_tile)))

    pad = n_pad - n
    if pad:  # zero rows/cols are exact for LayerNorm + matmul; sliced off at the end
        embeds = jnp.pad(embeds, ((0, pad), (0, 0)))
        adj = jnp.pad(adj, ((0, pad), (0, pad)))

    if gnn_layer == 0:
        out = _layernorm_call(embeds, tm, jnp.float32)
        return out[:n] if pad else out

    adj_bf = adj.astype(jnp.bfloat16)                 # cast ONCE, outside the kernels
    h = _layernorm_call(embeds, tm, jnp.bfloat16)     # blockwise LN -> bf16 h0

    if not force_tiled and _resident_need_bytes(n_pad, d) <= budget:
        out = _resident_call(adj_bf, h, gnn_layer, vmem_cap)
    else:
        acc = jnp.zeros((n_pad, d), jnp.float32)
        for _ in range(gnn_layer):
            h, acc = _layer_call(adj_bf, h, acc, tm, tk, vmem_cap, adj_buffer_count)
        out = acc
    return out[:n] if pad else out


# --------------------------------------------------------------------------- references
def _ref_f32(adj, embeds, gnn_layer):
    h = _layernorm_f32(embeds, LN_EPS)
    if gnn_layer == 0:
        return h
    acc = jnp.zeros_like(h)
    cur = h
    for _ in range(gnn_layer):
        cur = adj.astype(jnp.float32) @ cur
        acc = acc + cur
    return acc


def _ref_bf16(adj, embeds, gnn_layer):
    # Matches the kernel numerics on BOTH paths: bf16 adj, bf16 layer propagation,
    # f32 MXU accumulation, f32 running sum.
    h = _layernorm_f32(embeds, LN_EPS)
    if gnn_layer == 0:
        return h
    adj_bf = adj.astype(jnp.bfloat16)
    cur = h.astype(jnp.bfloat16)
    acc = jnp.zeros_like(h)
    for _ in range(gnn_layer):
        nxt = jnp.dot(adj_bf, cur, preferred_element_type=jnp.float32)
        acc = acc + nxt
        cur = nxt.astype(jnp.bfloat16)
    return acc


# --------------------------------------------------------------------------- demo / check
if __name__ == "__main__":
    key = jax.random.PRNGKey(0)
    k_a1, k_e1, k_a2, k_e2 = jax.random.split(key, 4)
    D = LATDIM

    def make_graph(ka, ke, n):
        mask = (jax.random.uniform(ka, (n, n)) < 0.05).astype(jnp.float32)
        mask = mask + jnp.eye(n, dtype=jnp.float32)          # self loops
        adj = mask / jnp.sum(mask, axis=1, keepdims=True)    # row-normalized (spmm stand-in)
        emb = jax.random.normal(ke, (n, D), dtype=jnp.float32)
        return adj, emb

    def check(out, adj, emb, L):
        tight = _ref_bf16(adj, emb, L)
        loose = _ref_f32(adj, emb, L)
        assert bool(jnp.allclose(out, tight, atol=5e-3, rtol=5e-3)), "tight mismatch"
        assert bool(jnp.allclose(out, loose, atol=5e-2, rtol=5e-2)), "loose mismatch"

    # 1) small graph -> VMEM-resident path (single block, bf16 adjacency)
    adj1, emb1 = make_graph(k_a1, k_e1, 256)
    out1 = jax.block_until_ready(topo_encoder(adj1, emb1, GNN_LAYER))
    assert out1.shape == (256, D)
    check(out1, adj1, emb1, GNN_LAYER)

    # 2) gnn_layer == 0 path (blockwise LayerNorm only)
    out0 = jax.block_until_ready(topo_encoder(adj1, emb1, 0))
    assert out0.shape == (256, D)
    assert bool(jnp.allclose(out0, _ref_f32(adj1, emb1, 0), atol=1e-5, rtol=1e-5))

    # 3) non-tileable N forced through the streamed per-layer path with small tiles:
    #    exercises zero padding, the (rows, contraction) grid, layer chaining and the
    #    in-place layer-sum aliasing.
    adj2, emb2 = make_graph(k_a2, k_e2, 300)
    out2 = jax.block_until_ready(
        topo_encoder(adj2, emb2, 3, force_tiled=True, max_tile=128))
    assert out2.shape == (300, D)
    check(out2, adj2, emb2, 3)

    print("KERNEL_OK")
</pallas_src>

<mosaic_0001>
module attributes {stable_mosaic.version = 11 : i64} {
  func.func @_ln_kernel(%arg0: i32, %arg1: memref<256x128xf32, #tpu.memory_space<vmem>>, %arg2: memref<256x128xbf16, #tpu.memory_space<vmem>>) attributes {dimension_semantics = [#tpu.dimension_semantics<parallel>], iteration_bounds = array<i64: 1>, scalar_prefetch = 0 : i64, scratch_operands = 0 : i64, tpu.core_type = #tpu.core_type<tc>, window_params = [{transform_indices = @transform_0, window_bounds = array<i64: 256, 128>}, {transform_indices = @transform_1, window_bounds = array<i64: 256, 128>}]} {
    %c0 = arith.constant 0 : index
    %c0_0 = arith.constant 0 : index
    %0 = vector.load %arg1[%c0, %c0_0] : memref<256x128xf32, #tpu.memory_space<vmem>>, vector<256x128xf32>
    %cst = arith.constant dense<0.000000e+00> : vector<256xf32>
    %1 = vector.multi_reduction <add>, %0, %cst [1] : vector<256x128xf32> to vector<256xf32>
    %2 = vector.shape_cast %1 : vector<256xf32> to vector<256x1xf32>
    %cst_1 = arith.constant 1.280000e+02 : f32
    %3 = vector.broadcast %cst_1 : f32 to vector<256x1xf32>
    %4 = arith.divf %2, %3 : vector<256x1xf32>
    %5 = arith.mulf %0, %0 : vector<256x128xf32>
    %cst_2 = arith.constant dense<0.000000e+00> : vector<256xf32>
    %6 = vector.multi_reduction <add>, %5, %cst_2 [1] : vector<256x128xf32> to vector<256xf32>
    %7 = vector.shape_cast %6 : vector<256xf32> to vector<256x1xf32>
    %cst_3 = arith.constant 1.280000e+02 : f32
    %8 = vector.broadcast %cst_3 : f32 to vector<256x1xf32>
    %9 = arith.divf %7, %8 : vector<256x1xf32>
    %10 = arith.mulf %4, %4 : vector<256x1xf32>
    %11 = arith.subf %9, %10 : vector<256x1xf32>
    %cst_4 = arith.constant 0.000000e+00 : f32
    %12 = vector.broadcast %cst_4 : f32 to vector<256x1xf32>
    %13 = arith.maximumf %11, %12 : vector<256x1xf32>
    %14 = vector.broadcast %4 : vector<256x1xf32> to vector<256x128xf32>
    %15 = arith.subf %0, %14 : vector<256x128xf32>
    %cst_5 = arith.constant 9.99999974E-6 : f32
    %16 = vector.broadcast %cst_5 : f32 to vector<256x1xf32>
    %17 = arith.addf %13, %16 : vector<256x1xf32>
    %18 = math.rsqrt %17 : vector<256x1xf32>
    %19 = vector.broadcast %18 : vector<256x1xf32> to vector<256x128xf32>
    %20 = arith.mulf %15, %19 : vector<256x128xf32>
    %21 = arith.truncf %20 : vector<256x128xf32> to vector<256x128xbf16>
    %c0_6 = arith.constant 0 : index
    %c0_7 = arith.constant 0 : index
    %22 = vector.load %arg2[%c0_6, %c0_7] : memref<256x128xbf16, #tpu.memory_space<vmem>>, vector<256x128xbf16>
    tpu.vector_store %arg2[%c0_6, %c0_7], %21 {strides = array<i32>} : memref<256x128xbf16, #tpu.memory_space<vmem>>, vector<256x128xbf16>,
    return
  }
  func.func @transform_0(%arg0: i32) -> (i32, i32) {
    %c0_i32 = arith.constant 0 : i32
    %c0_i32_0 = arith.constant 0 : i32
    return %arg0, %c0_i32 : i32, i32
  }
  func.func @transform_1(%arg0: i32) -> (i32, i32) {
    %c0_i32 = arith.constant 0 : i32
    %c0_i32_0 = arith.constant 0 : i32
    return %arg0, %c0_i32 : i32, i32
  }
}

</mosaic_0001>

<bundles_post_ra>
// kernel: tpu_custom_call.1
= control target key start
LH: loop header
LB: loop body
LE: loop exit
PB: predicated region body
PF: predicated region fallthrough
CT: control target
= control target key end

     0   :  { %6 = vsyncpa [#allocation3], 0  ;;  %s1521_s0 = inlined_call_operand.hbm [shape: f32[256,128], index: 0, kind: input, shape index: {}]   ;;  %s1522_s1 = inlined_call_operand.hbm [shape: bf16[256,128], index: 1, kind: output, shape index: {}]  }
   0x1   :  { %7 = vsyncpa [#allocation4], 0  ;;  %s958_s6 = smov [#allocation2]   ;;  %s910_s10 = scalar_lea.hbm %s1521_s0, 4096 }
   0x2   :  { %s13_s7 = sshll.u32 %s958_s6, 4  ;;  %p911_p0 = scmp.ne.s32.totalorder %s1521_s0, %s910_s10  ;;  %s14_s7 = int_to_ptr.vmem [resolvable:$true] %s13_s7 }
   0x3   :  { %p914_p1 = scmp.lt.u32.totalorder %s910_s10, %s1521_s0 }
   0x5   :  { %p916_p2 = pnand %p914_p1, %p911_p0 }
   0x7   :  { %919 = shalt.err (!%p916_p2)
}
   0x8   :  { %s920_s15 = scalar_lea.vmem %s14_s7, 4096  ;;  %p925_p4 = scmp.lt.s32.totalorder %s14_s7, %s14_s7 }
   0x9   :  { %p921_p3 = scmp.ne.s32.totalorder %s14_s7, %s920_s15  ;;  %p926_p5 = scmp.lt.s32.totalorder %s920_s15, %s920_s15 }
   0xb   :  { %p927_p6 = por %p926_p5, %p925_p4 }
   0xd   :  { %p928_p7 = pnand %p927_p6, %p921_p3 }
   0xf   :  { %931 = shalt.err (!%p928_p7)
}
  0x10   :  { %s959_s16 = smov 128   ;;  %s960_s17 = smov 8  }
  0x11   :  { %19 = dma.hbm_to_vmem [thread:$0]  %s1521_s0, 4096, %s14_s7, [#allocation3], %s959_s16, %s959_s16, %s960_s17  }
  0x12   :  { %954 = dma.done.wait [#allocation3], 4096  }
  0x13   :  { %955 = vsyncadd [#allocation3], 4294963200  ;;  %v986_v0 = vld [vmem:[#allocation2 + $0x10] sm:$0xff]  ;;  %v988_v1 = vld [vmem:[#allocation2] sm:$0xff]  ;;  %s961_s0 = smov [#allocation5]  }
  0x14   :  { %59 = vadd.xlane.f32.xlu1 %v986_v0  ;;  %55 = vadd.xlane.f32.xlu0 %v988_v1  ;;  %v992_v2 = vld [vmem:[#allocation2 + $0x18] sm:$0xff]  ;;  %v994_v3 = vld [vmem:[#allocation2 + $0x8] sm:$0xff]  ;;  %v1000_v5 = vld [vmem:[#allocation2 + $0x20] sm:$0xff]  ;;  %v152_v33 = vmul.f32 %v988_v1, %v988_v1  ;;  %v154_v35 = vmul.f32 %v986_v0, %v986_v0  ;;  %s669_s20 = sshll.u32 %s961_s0, 4  ;;  %s670_s20 = int_to_ptr.vmem [resolvable:$true] %s669_s20 }
  0x15   :  { %v998_v4 = vld [vmem:[#allocation2 + $0x28] sm:$0xff]  ;;  %v1004_v6 = vld [vmem:[#allocation2 + $0x38] sm:$0xff]  ;;  %v1006_v7 = vld [vmem:[#allocation2 + $0x30] sm:$0xff]  ;;  %v153_v32 = vmul.f32 %v994_v3, %v994_v3  ;;  %v155_v34 = vmul.f32 %v992_v2, %v992_v2  ;;  %v156_v37 = vmul.f32 %v1000_v5, %v1000_v5  ;;  %s932_s21 = scalar_lea.vmem %s670_s20, 2048  ;;  %p937_p9 = scmp.lt.s32.totalorder %s670_s20, %s670_s20 }
  0x16   :  { %1541 = vst [vmem:[#allocation8_spill] sm:$0xff] %v1004_v6  ;;  %v1010_v8 = vld [vmem:[#allocation2 + $0x48] sm:$0xff]  ;;  %v1012_v9 = vld [vmem:[#allocation2 + $0x40] sm:$0xff]  ;;  %v1016_v10 = vld [vmem:[#allocation2 + $0x58] sm:$0xff]  ;;  %v157_v36 = vmul.f32 %v998_v4, %v998_v4  ;;  %v159_v38 = vmul.f32 %v1004_v6, %v1004_v6  ;;  %v158_v39 = vmul.f32 %v1006_v7, %v1006_v7  ;;  %p933_p8 = scmp.ne.s32.totalorder %s670_s20, %s932_s21  ;;  %p938_p10 = scmp.lt.s32.totalorder %s932_s21, %s932_s21 }
  0x17   :  { %v1018_v11 = vld [vmem:[#allocation2 + $0x50] sm:$0xff]  ;;  %v1022_v12 = vld [vmem:[#allocation2 + $0x68] sm:$0xff]  ;;  %v1024_v13 = vld [vmem:[#allocation2 + $0x60] sm:$0xff]  ;;  %v161_v40 = vmul.f32 %v1010_v8, %v1010_v8  ;;  %v160_v41 = vmul.f32 %v1012_v9, %v1012_v9  ;;  %v163_v42 = vmul.f32 %v1016_v10, %v1016_v10 }
  0x18   :  { %61 = vadd.xlane.f32.xlu1 %v992_v2  ;;  %57 = vadd.xlane.f32.xlu0 %v994_v3  ;;  %1542 = vst [vmem:[#allocation9_spill] sm:$0xff] %v1018_v11  ;;  %v1028_v14 = vld [vmem:[#allocation2 + $0x78] sm:$0xff]  ;;  %v1030_v15 = vld [vmem:[#allocation2 + $0x70] sm:$0xff]  ;;  %v1034_v16 = vld [vmem:[#allocation2 + $0x88] sm:$0xff]  ;;  %v162_v43 = vmul.f32 %v1018_v11, %v1018_v11  ;;  %v165_v44 = vmul.f32 %v1022_v12, %v1022_v12  ;;  %p939_p11 = por %p938_p10, %p937_p9 }
  0x19   :  { %v1036_v17 = vld [vmem:[#allocation2 + $0x80] sm:$0xff]  ;;  %v1040_v18 = vld [vmem:[#allocation2 + $0x98] sm:$0xff]  ;;  %v1042_v19 = vld [vmem:[#allocation2 + $0x90] sm:$0xff]  ;;  %v164_v45 = vmul.f32 %v1024_v13, %v1024_v13  ;;  %v167_v46 = vmul.f32 %v1028_v14, %v1028_v14  ;;  %v166_v47 = vmul.f32 %v1030_v15, %v1030_v15  ;;  %v169_v48 = vmul.f32 %v1034_v16, %v1034_v16 }
  0x1a   :  { %v1046_v20 = vld [vmem:[#allocation2 + $0xa8] sm:$0xff]  ;;  %v1048_v21 = vld [vmem:[#allocation2 + $0xa0] sm:$0xff]  ;;  %v1052_v22 = vld [vmem:[#allocation2 + $0xb8] sm:$0xff]  ;;  %v168_v49 = vmul.f32 %v1036_v17, %v1036_v17  ;;  %v171_v50 = vmul.f32 %v1040_v18, %v1040_v18  ;;  %v170_v51 = vmul.f32 %v1042_v19, %v1042_v19  ;;  %p940_p12 = pnand %p939_p11, %p933_p8 }
  0x1b   :  { %1543 = vst [vmem:[#allocation10_spill] sm:$0xff] %v1048_v21  ;;  %1544 = vst [vmem:[#allocation11_spill] sm:$0xff] %v1052_v22  ;;  %v1054_v23 = vld [vmem:[#allocation2 + $0xb0] sm:$0xff]  ;;  %v1058_v24 = vld [vmem:[#allocation2 + $0xc8] sm:$0xff]  ;;  %v173_v52 = vmul.f32 %v1046_v20, %v1046_v20  ;;  %v172_v53 = vmul.f32 %v1048_v21, %v1048_v21  ;;  %v175_v54 = vmul.f32 %v1052_v22, %v1052_v22 }
  0x1c   :  { %65 = vadd.xlane.f32.xlu1 %v998_v4  ;;  %63 = vadd.xlane.f32.xlu0 %v1000_v5  ;;  %1545 = vst [vmem:[#allocation12_spill] sm:$0xff] %v1054_v23  ;;  %1546 = vst [vmem:[#allocation13_spill] sm:$0xff] %v1058_v24  ;;  %v1060_v25 = vld [vmem:[#allocation2 + $0xc0] sm:$0xff]  ;;  %v1064_v26 = vld [vmem:[#allocation2 + $0xd8] sm:$0xff]  ;;  %v174_v55 = vmul.f32 %v1054_v23, %v1054_v23  ;;  %v177_v56 = vmul.f32 %v1058_v24, %v1058_v24 }
  0x1d   :  { %1547 = vst [vmem:[#allocation14_spill] sm:$0xff] %v1060_v25  ;;  %1548 = vst [vmem:[#allocation15_spill] sm:$0xff] %v1064_v26  ;;  %v1066_v27 = vld [vmem:[#allocation2 + $0xd0] sm:$0xff]  ;;  %v1070_v28 = vld [vmem:[#allocation2 + $0xe8] sm:$0xff]  ;;  %v176_v57 = vmul.f32 %v1060_v25, %v1060_v25  ;;  %v179_v58 = vmul.f32 %v1064_v26, %v1064_v26 }
  0x1e   :  { %1549 = vst [vmem:[#allocation16_spill] sm:$0xff] %v1066_v27  ;;  %1550 = vst [vmem:[#allocation17_spill] sm:$0xff] %v1070_v28  ;;  %v1072_v29 = vld [vmem:[#allocation2 + $0xe0] sm:$0xff]  ;;  %v1076_v30 = vld [vmem:[#allocation2 + $0xf8] sm:$0xff]  ;;  %v178_v59 = vmul.f32 %v1066_v27, %v1066_v27  ;;  %v181_v60 = vmul.f32 %v1070_v28, %v1070_v28 }
  0x1f   :  { %1551 = vst [vmem:[#allocation18_spill] sm:$0xff] %v1072_v29  ;;  %1552 = vst [vmem:[#allocation19_spill] sm:$0xff] %v1076_v30  ;;  %v1078_v31 = vld [vmem:[#allocation2 + $0xf0] sm:$0xff]  ;;  %v180_v61 = vmul.f32 %v1072_v29, %v1072_v29  ;;  %v183_v62 = vmul.f32 %v1076_v30, %v1076_v30 }
  0x20   :  { %69 = vadd.xlane.f32.xlu1 %v1004_v6  ;;  %67 = vadd.xlane.f32.xlu0 %v1006_v7  ;;  %1553 = vst [vmem:[#allocation20_spill] sm:$0xff] %v1078_v31  ;;  %v182_v63 = vmul.f32 %v1078_v31, %v1078_v31 }
  0x24   :  { %73 = vadd.xlane.f32.xlu1 %v1010_v8  ;;  %71 = vadd.xlane.f32.xlu0 %v1012_v9 }
  0x28   :  { %77 = vadd.xlane.f32.xlu1 %v1016_v10  ;;  %75 = vadd.xlane.f32.xlu0 %v1018_v11 }
  0x2c   :  { %81 = vadd.xlane.f32.xlu1 %v1022_v12  ;;  %79 = vadd.xlane.f32.xlu0 %v1024_v13 }
  0x30   :  { %85 = vadd.xlane.f32.xlu1 %v1028_v14  ;;  %83 = vadd.xlane.f32.xlu0 %v1030_v15 }
  0x34   :  { %89 = vadd.xlane.f32.xlu1 %v1034_v16  ;;  %87 = vadd.xlane.f32.xlu0 %v1036_v17 }
  0x38   :  { %93 = vadd.xlane.f32.xlu1 %v1040_v18  ;;  %91 = vadd.xlane.f32.xlu0 %v1042_v19 }
  0x3c   :  { %97 = vadd.xlane.f32.xlu1 %v1046_v20  ;;  %95 = vadd.xlane.f32.xlu0 %v1048_v21 }
  0x40   :  { %101 = vadd.xlane.f32.xlu1 %v1052_v22  ;;  %99 = vadd.xlane.f32.xlu0 %v1054_v23 }
  0x44   :  { %105 = vadd.xlane.f32.xlu1 %v1058_v24  ;;  %103 = vadd.xlane.f32.xlu0 %v1060_v25 }
  0x48   :  { %109 = vadd.xlane.f32.xlu1 %v1064_v26  ;;  %107 = vadd.xlane.f32.xlu0 %v1066_v27 }
  0x4c   :  { %113 = vadd.xlane.f32.xlu1 %v1070_v28  ;;  %111 = vadd.xlane.f32.xlu0 %v1072_v29 }
  0x50   :  { %117 = vadd.xlane.f32.xlu1 %v1076_v30  ;;  %115 = vadd.xlane.f32.xlu0 %v1078_v31 }
  0x54   :  { %186 = vadd.xlane.f32.xlu1 %v153_v32  ;;  %184 = vadd.xlane.f32.xlu0 %v152_v33 }
  0x58   :  { %190 = vadd.xlane.f32.xlu1 %v155_v34  ;;  %188 = vadd.xlane.f32.xlu0 %v154_v35 }
  0x5c   :  { %194 = vadd.xlane.f32.xlu1 %v157_v36  ;;  %192 = vadd.xlane.f32.xlu0 %v156_v37 }
  0x60   :  { %198 = vadd.xlane.f32.xlu1 %v159_v38  ;;  %196 = vadd.xlane.f32.xlu0 %v158_v39 }
  0x64   :  { %202 = vadd.xlane.f32.xlu1 %v161_v40  ;;  %200 = vadd.xlane.f32.xlu0 %v160_v41 }
  0x68   :  { %206 = vadd.xlane.f32.xlu1 %v163_v42  ;;  %204 = vadd.xlane.f32.xlu0 %v162_v43 }
  0x6c   :  { %210 = vadd.xlane.f32.xlu1 %v165_v44  ;;  %208 = vadd.xlane.f32.xlu0 %v164_v45 }
  0x70   :  { %214 = vadd.xlane.f32.xlu1 %v167_v46  ;;  %212 = vadd.xlane.f32.xlu0 %v166_v47 }
  0x74   :  { %218 = vadd.xlane.f32.xlu1 %v169_v48  ;;  %216 = vadd.xlane.f32.xlu0 %v168_v49 }
  0x78   :  { %222 = vadd.xlane.f32.xlu1 %v171_v50  ;;  %220 = vadd.xlane.f32.xlu0 %v170_v51 }
  0x7c   :  { %226 = vadd.xlane.f32.xlu1 %v173_v52  ;;  %224 = vadd.xlane.f32.xlu0 %v172_v53 }
  0x80   :  { %230 = vadd.xlane.f32.xlu1 %v175_v54  ;;  %228 = vadd.xlane.f32.xlu0 %v174_v55 }
  0x84   :  { %234 = vadd.xlane.f32.xlu1 %v177_v56  ;;  %232 = vadd.xlane.f32.xlu0 %v176_v57 }
  0x88   :  { %238 = vadd.xlane.f32.xlu1 %v179_v58  ;;  %236 = vadd.xlane.f32.xlu0 %v178_v59 }
  0x8c   :  { %242 = vadd.xlane.f32.xlu1 %v181_v60  ;;  %240 = vadd.xlane.f32.xlu0 %v180_v61 }
  0x90   :  { %246 = vadd.xlane.f32.xlu1 %v183_v62  ;;  %244 = vadd.xlane.f32.xlu0 %v182_v63 }
  0xa1   :  { %v60_v32 = vpop.xlane.xlu1 %59  ;;  %v56_v33 = vpop.xlane.xlu0 %55 }
  0xa2   :  { %v1180_v62 = vmul.f32 0.0078125, %v60_v32  ;;  %v1182_v63 = vmul.f32 0.0078125, %v56_v33 }
  0xa4   :  { %v282_v26 = vmul.f32 %v1180_v62, %v1180_v62  ;;  %v280_v33 = vmul.f32 %v1182_v63, %v1182_v63 }
  0xa5   :  { %v62_v34 = vpop.xlane.xlu1 %61  ;;  %v58_v35 = vpop.xlane.xlu0 %57 }
  0xa6   :  { %v1184_v31 = vmul.f32 0.0078125, %v62_v34  ;;  %v1186_v30 = vmul.f32 0.0078125, %v58_v35 }
  0xa9   :  { %v66_v36 = vpop.xlane.xlu1 %65  ;;  %v64_v37 = vpop.xlane.xlu0 %63 }
  0xaa   :  { %v1188_v29 = vmul.f32 0.0078125, %v66_v36  ;;  %v1196_v25 = vmul.f32 0.0078125, %v64_v37  ;;  %v283_v36 = vmul.f32 %v1184_v31, %v1184_v31  ;;  %v281_v37 = vmul.f32 %v1186_v30, %v1186_v30 }
  0xac   :  { %v285_v22 = vmul.f32 %v1188_v29, %v1188_v29  ;;  %v284_v24 = vmul.f32 %v1196_v25, %v1196_v25 }
  0xad   :  { %v70_v38 = vpop.xlane.xlu1 %69  ;;  %v68_v39 = vpop.xlane.xlu0 %67 }
  0xae   :  { %v1204_v35 = vmul.f32 0.0078125, %v70_v38  ;;  %v1212_v23 = vmul.f32 0.0078125, %v68_v39 }
  0xb0   :  { %1564 = vst [vmem:[#allocation31_spill] sm:$0xff] %v1204_v35  ;;  %v1228_v32 = vmul.f32 %v1204_v35, %v1204_v35 }
  0xb1   :  { %v74_v40 = vpop.xlane.xlu1 %73  ;;  %v72_v41 = vpop.xlane.xlu0 %71 }
  0xb2   :  { %v1220_v34 = vmul.f32 0.0078125, %v74_v40  ;;  %v1232_v38 = vmul.f32 0.0078125, %v72_v41 }
  0xb5   :  { %v78_v42 = vpop.xlane.xlu1 %77  ;;  %v76_v43 = vpop.xlane.xlu0 %75 }
  0xb6   :  { %v1234_v40 = vmul.f32 0.0078125, %v78_v42  ;;  %v1248_v41 = vmul.f32 0.0078125, %v76_v43 }
  0xb8   :  { %1565 = vst [vmem:[#allocation32_spill] sm:$0xff] %v1248_v41 }
  0xb9   :  { %v82_v44 = vpop.xlane.xlu1 %81  ;;  %v1146_v45 = vpop.xlane.xlu0 %79 }
  0xba   :  { %v1250_v42 = vmul.f32 0.0078125, %v82_v44  ;;  %v1263_v43 = vmul.f32 0.0078125, %v1146_v45 }
  0xbc   :  { %1566 = vst [vmem:[#allocation33_spill] sm:$0xff] %v1250_v42 }
  0xbd   :  { %v1148_v46 = vpop.xlane.xlu1 %85  ;;  %v1150_v47 = vpop.xlane.xlu0 %83 }
  0xc1   :  { %v1152_v48 = vpop.xlane.xlu1 %89  ;;  %v1154_v49 = vpop.xlane.xlu0 %87 }
  0xc5   :  { %v1156_v50 = vpop.xlane.xlu1 %93  ;;  %v1158_v51 = vpop.xlane.xlu0 %91 }
  0xc9   :  { %v1160_v52 = vpop.xlane.xlu1 %97  ;;  %v1162_v53 = vpop.xlane.xlu0 %95 }
  0xcd   :  { %v1164_v54 = vpop.xlane.xlu1 %101  ;;  %v1166_v55 = vpop.xlane.xlu0 %99 }
  0xce   :  { %1554 = vst [vmem:[#allocation21_spill] sm:$0xff] %v1164_v54  ;;  %1555 = vst [vmem:[#allocation22_spill] sm:$0xff] %v1166_v55 }
  0xd1   :  { %v1168_v56 = vpop.xlane.xlu1 %105  ;;  %v1170_v57 = vpop.xlane.xlu0 %103 }
  0xd2   :  { %1556 = vst [vmem:[#allocation23_spill] sm:$0xff] %v1168_v56  ;;  %1557 = vst [vmem:[#allocation24_spill] sm:$0xff] %v1170_v57  ;;  %v1244_v57 = vmul.f32 %v1220_v34, %v1220_v34 }
  0xd5   :  { %v1172_v58 = vpop.xlane.xlu1 %109  ;;  %v1174_v59 = vpop.xlane.xlu0 %107 }
  0xd6   :  { %1558 = vst [vmem:[#allocation25_spill] sm:$0xff] %v1172_v58  ;;  %1559 = vst [vmem:[#allocation26_spill] sm:$0xff] %v1174_v59  ;;  %v1238_v58 = vmul.f32 %v1212_v23, %v1212_v23  ;;  %v1275_v59 = vmul.f32 %v1250_v42, %v1250_v42 }
  0xd9   :  { %v1176_v60 = vpop.xlane.xlu1 %113  ;;  %v1178_v61 = vpop.xlane.xlu0 %111 }
  0xda   :  { %1560 = vst [vmem:[#allocation27_spill] sm:$0xff] %v1176_v60  ;;  %1561 = vst [vmem:[#allocation28_spill] sm:$0xff] %v1178_v61 }
  0xdd   :  { %v1190_v28 = vpop.xlane.xlu1 %117  ;;  %v1192_v27 = vpop.xlane.xlu0 %115 }
  0xde   :  { %1562 = vst [vmem:[#allocation29_spill] sm:$0xff] %v1190_v28  ;;  %1563 = vst [vmem:[#allocation30_spill] sm:$0xff] %v1192_v27 }
  0xe1   :  { %v187_v27 = vpop.xlane.xlu1 %186  ;;  %v185_v28 = vpop.xlane.xlu0 %184 }
  0xe2   :  { %v249_v61 = vmul.f32 0.0078125, %v187_v27  ;;  %v248_v60 = vmul.f32 0.0078125, %v185_v28 }
  0xe4   :  { %v313_v27 = vsub.f32 %v249_v61, %v281_v37  ;;  %v312_v28 = vsub.f32 %v248_v60, %v280_v33  ;;  %v1254_v60 = vmul.f32 %v1232_v38, %v1232_v38  ;;  %v1260_v33 = vmul.f32 %v1234_v40, %v1234_v40 }
  0xe5   :  { %v191_v56 = vpop.xlane.xlu1 %190  ;;  %v189_v55 = vpop.xlane.xlu0 %188  ;;  %v1284_v61 = vmul.f32 %v1263_v43, %v1263_v43 }
  0xe6   :  { %v345_v21 = vmax.f32 %v313_v27, 0.0  ;;  %v344_v54 = vmax.f32 %v312_v28, 0.0  ;;  %v251_v35 = vmul.f32 0.0078125, %v191_v56  ;;  %v250_v6 = vmul.f32 0.0078125, %v189_v55 }
  0xe7   :  { %v1269_v56 = vmul.f32 %v1248_v41, %v1248_v41 }
  0xe8   :  { %v409_v44 = vadd.f32 1e-05, %v345_v21  ;;  %v408_v37 = vadd.f32 1e-05, %v344_v54  ;;  %v315_v27 = vsub.f32 %v251_v35, %v283_v36  ;;  %v314_v28 = vsub.f32 %v250_v6, %v282_v26 }
  0xe9   :  { %v195_v45 = vpop.xlane.xlu1 %194  ;;  %v193_v39 = vpop.xlane.xlu0 %192  ;;  %v1280_v35 = vmul.f32 0.0078125, %v1148_v46 }
  0xea   :  { %846 = vrsqrt.f32 %v409_v44  ;;  %v347_v21 = vmax.f32 %v315_v27, 0.0  ;;  %v346_v54 = vmax.f32 %v314_v28, 0.0  ;;  %v253_v6 = vmul.f32 0.0078125, %v195_v45 }
  0xeb   :  { %848 = vrsqrt.f32 %v408_v37  ;;  %v252_v36 = vmul.f32 0.0078125, %v193_v39  ;;  %v1289_v27 = vmul.f32 0.0078125, %v1150_v47  ;;  %v1292_v28 = vmul.f32 0.0078125, %v1152_v48 }
  0xec   :  { %v411_v55 = vadd.f32 1e-05, %v347_v21  ;;  %v410_v41 = vadd.f32 1e-05, %v346_v54  ;;  %v317_v11 = vsub.f32 %v253_v6, %v285_v22  ;;  %v1296_v21 = vmul.f32 %v1280_v35, %v1280_v35 }
  0xed   :  { %v316_v46 = vsub.f32 %v252_v36, %v284_v24  ;;  %v199_v45 = vpop.xlane.xlu1 %198  ;;  %v197_v37 = vpop.xlane.xlu0 %196  ;;  %v1301_v54 = vmul.f32 0.0078125, %v1154_v49  ;;  %v1313_v36 = vmul.f32 %v1292_v28, %v1292_v28 }
  0xee   :  { %850 = vrsqrt.f32 %v411_v55  ;;  %v349_v39 = vmax.f32 %v317_v11, 0.0  ;;  %v255_v26 = vmul.f32 0.0078125, %v199_v45  ;;  %v254_v42 = vmul.f32 0.0078125, %v197_v37 }
  0xef   :  { %852 = vrsqrt.f32 %v410_v41  ;;  %v348_v47 = vmax.f32 %v316_v46, 0.0  ;;  %1567 = vst [vmem:[#allocation34_spill] sm:$0xff] %v1301_v54  ;;  %v1307_v11 = vmul.f32 %v1289_v27, %v1289_v27  ;;  %v1322_v6 = vmul.f32 %v1301_v54, %v1301_v54 }
  0xf0   :  { %v413_v48 = vadd.f32 1e-05, %v349_v39  ;;  %v319_v24 = vsub.f32 %v255_v26, %v1228_v32  ;;  %v318_v55 = vsub.f32 %v254_v42, %v1238_v58  ;;  %v1318_v42 = vmul.f32 0.0078125, %v1156_v50 }
  0xf1   :  { %v412_v41 = vadd.f32 1e-05, %v348_v47  ;;  %v203_v46 = vpop.xlane.xlu1 %202  ;;  %v201_v49 = vpop.xlane.xlu0 %200  ;;  %v1568_v50 = vsub.f32 %v994_v3, %v1186_v30 }
  0xf2   :  { %854 = vrsqrt.f32 %v413_v48  ;;  %v351_v45 = vmax.f32 %v319_v24, 0.0  ;;  %v350_v37 = vmax.f32 %v318_v55, 0.0  ;;  %v257_v32 = vmul.f32 0.0078125, %v203_v46 }
  0xf3   :  { %856 = vrsqrt.f32 %v412_v41  ;;  %v256_v26 = vmul.f32 0.0078125, %v201_v49  ;;  %v1328_v46 = vmul.f32 0.0078125, %v1158_v51  ;;  %v1339_v55 = vmul.f32 %v1318_v42, %v1318_v42 }
  0xf4   :  { %v847_v39 = vpop.eup %846  ;;  %v415_v47 = vadd.f32 1e-05, %v351_v45  ;;  %v414_v22 = vadd.f32 1e-05, %v350_v37  ;;  %v321_v48 = vsub.f32 %v257_v32, %v1244_v57  ;;  %v1569_v45 = vsub.f32 %v988_v1, %v1182_v63 }
  0xf5   :  { %v849_v24 = vpop.eup %848  ;;  %v473_v41 = vmul.f32 %v847_v39, %v1568_v50  ;;  %v320_v49 = vsub.f32 %v256_v26, %v1254_v60  ;;  %v207_v58 = vpop.xlane.xlu1 %206  ;;  %v395_v30 = vsub.f32 %v1040_v18, %v1318_v42  ;;  %v1346_v63 = vmul.f32 %v1328_v46, %v1328_v46  ;;  %v1603_v42 = vld [vmem:[#allocation11_spill] sm:$0xff] }
  0xf6   :  { %v205_v44 = vpop.xlane.xlu0 %204  ;;  %v472_v37 = vmul.f32 %v849_v24, %v1569_v45  ;;  %858 = vrsqrt.f32 %v415_v47  ;;  %v353_v57 = vmax.f32 %v321_v48, 0.0  ;;  %v259_v32 = vmul.f32 0.0078125, %v207_v58 }
  0xf7   :  { %860 = vrsqrt.f32 %v414_v22  ;;  %v352_v51 = vmax.f32 %v320_v49, 0.0  ;;  %v258_v54 = vmul.f32 0.0078125, %v205_v44  ;;  %v1570_v58 = vsub.f32 %v992_v2, %v1184_v31 }
  0xf8   :  { %v851_v3 = vpop.eup %850  ;;  %v748_v60 = vpack.c.bf16 %v473_v41, %v472_v37  ;;  %v417_v26 = vadd.f32 1e-05, %v353_v57  ;;  %v323_v39 = vsub.f32 %v259_v32, %v1260_v33  ;;  %v1571_v50 = vsub.f32 %v986_v0, %v1180_v62 }
  0xf9   :  { %v853_v1 = vpop.eup %852  ;;  %v475_v47 = vmul.f32 %v851_v3, %v1570_v58  ;;  %v416_v22 = vadd.f32 1e-05, %v352_v51  ;;  %v322_v44 = vsub.f32 %v258_v54, %v1269_v56  ;;  %v211_v48 = vpop.xlane.xlu1 %210  ;;  %v1356_v45 = vmul.f32 0.0078125, %v1160_v52 }
  0xfa   :  { %v209_v24 = vpop.xlane.xlu0 %208  ;;  %749 = vst [vmem:[#allocation5] sm:$0xff] %v748_v60   ;;  %v474_v41 = vmul.f32 %v853_v1, %v1571_v50  ;;  %862 = vrsqrt.f32 %v417_v26  ;;  %v355_v33 = vmax.f32 %v323_v39, 0.0  ;;  %v261_v49 = vmul.f32 0.0078125, %v211_v48  ;;  %v1574_v50 = vld [vmem:[#allocation8_spill] sm:$0xff] }
  0xfb   :  { %864 = vrsqrt.f32 %v416_v22  ;;  %v354_v37 = vmax.f32 %v322_v44, 0.0  ;;  %v260_v2 = vmul.f32 0.0078125, %v209_v24  ;;  %v394_v56 = vsub.f32 %v1042_v19, %v1328_v46 }
  0xfc   :  { %v855_v31 = vpop.eup %854  ;;  %v753_v54 = vpack.c.bf16 %v475_v47, %v474_v41  ;;  %v419_v57 = vadd.f32 1e-05, %v355_v33  ;;  %v325_v32 = vsub.f32 %v261_v49, %v1275_v59  ;;  %v1362_v0 = vmul.f32 0.0078125, %v1162_v53  ;;  %v1575_v41 = vld [vmem:[#allocation31_spill] sm:$0xff] }
  0xfd   :  { %v857_v51 = vpop.eup %856  ;;  %v1572_v62 = vsub.f32 %v998_v4, %v1188_v29  ;;  %v418_v3 = vadd.f32 1e-05, %v354_v37  ;;  %v324_v60 = vsub.f32 %v260_v2, %v1284_v61  ;;  %v215_v26 = vpop.xlane.xlu1 %214  ;;  %v1573_v1 = vsub.f32 %v1000_v5, %v1196_v25 }
  0xfe   :  { %v213_v39 = vpop.xlane.xlu0 %212  ;;  %825 = vst [vmem:[#allocation5 + $0x8] sm:$0xff] %v753_v54   ;;  %866 = vrsqrt.f32 %v419_v57  ;;  %v357_v59 = vmax.f32 %v325_v32, 0.0  ;;  %v263_v47 = vmul.f32 0.0078125, %v215_v26  ;;  %v1373_v53 = vmul.f32 %v1356_v45, %v1356_v45 }
  0xff   :  { %v477_v52 = vmul.f32 %v855_v31, %v1572_v62  ;;  %v476_v58 = vmul.f32 %v857_v51, %v1573_v1  ;;  %868 = vrsqrt.f32 %v418_v3  ;;  %v356_v4 = vmax.f32 %v324_v60, 0.0  ;;  %v1578_v62 = vld [vmem:[#allocation21_spill] sm:$0xff] }
 0x100   :  { %v262_v29 = vmul.f32 0.0078125, %v213_v39  ;;  %v859_v22 = vpop.eup %858  ;;  %v397_v61 = vsub.f32 %v1046_v20, %v1356_v45  ;;  %v421_v48 = vadd.f32 1e-05, %v357_v59  ;;  %v327_v24 = vsub.f32 %v263_v47, %v1296_v21  ;;  %v1579_v39 = vld [vmem:[#allocation10_spill] sm:$0xff]  ;;  %v1604_v45 = vld [vmem:[#allocation12_spill] sm:$0xff] }
 0x101   :  { %v758_v44 = vpack.c.bf16 %v477_v52, %v476_v58  ;;  %v861_v5 = vpop.eup %860  ;;  %v1380_v25 = vmul.f32 %v1362_v0, %v1362_v0  ;;  %v1576_v33 = vsub.f32 %v1574_v50, %v1575_v41  ;;  %v420_v37 = vadd.f32 1e-05, %v356_v4  ;;  %v219_v31 = vpop.xlane.xlu1 %218 }
 0x102   :  { %v326_v2 = vsub.f32 %v262_v29, %v1307_v11  ;;  %v217_v54 = vpop.xlane.xlu0 %216  ;;  %v1577_v57 = vsub.f32 %v1006_v7, %v1212_v23  ;;  %870 = vrsqrt.f32 %v421_v48  ;;  %v359_v21 = vmax.f32 %v327_v24, 0.0  ;;  %v1580_v7 = vld [vmem:[#allocation22_spill] sm:$0xff] }
 0x103   :  { %v479_v49 = vmul.f32 %v859_v22, %v1576_v33  ;;  %826 = vst [vmem:[#allocation5 + $0x10] sm:$0xff] %v758_v44   ;;  %v265_v51 = vmul.f32 0.0078125, %v219_v31  ;;  %v1390_v52 = vmul.f32 0.0078125, %v1578_v62  ;;  %872 = vrsqrt.f32 %v420_v37  ;;  %v1583_v37 = vld [vmem:[#allocation23_spill] sm:$0xff] }
 0x104   :  { %v478_v32 = vmul.f32 %v861_v5, %v1577_v57  ;;  %v358_v3 = vmax.f32 %v326_v2, 0.0  ;;  %v264_v60 = vmul.f32 0.0078125, %v217_v54  ;;  %v863_v26 = vpop.eup %862  ;;  %v396_v11 = vsub.f32 %v1579_v39, %v1362_v0 }
 0x105   :  { %v423_v58 = vadd.f32 1e-05, %v359_v21  ;;  %v329_v59 = vsub.f32 %v265_v51, %v1313_v36  ;;  %v865_v47 = vpop.eup %864  ;;  %v1396_v23 = vmul.f32 0.0078125, %v1580_v7  ;;  %v1581_v4 = vsub.f32 %v1010_v8, %v1220_v34  ;;  %v223_v48 = vpop.xlane.xlu1 %222 }
 0x106   :  { %v763_v1 = vpack.c.bf16 %v479_v49, %v478_v32  ;;  %v422_v22 = vadd.f32 1e-05, %v358_v3  ;;  %v328_v44 = vsub.f32 %v264_v60, %v1322_v6  ;;  %v221_v24 = vpop.xlane.xlu0 %220  ;;  %v1582_v5 = vsub.f32 %v1012_v9, %v1232_v38  ;;  %v1585_v60 = vld [vmem:[#allocation9_spill] sm:$0xff] }
 0x107   :  { %v481_v29 = vmul.f32 %v863_v26, %v1581_v4  ;;  %874 = vrsqrt.f32 %v423_v58  ;;  %v361_v36 = vmax.f32 %v329_v59, 0.0  ;;  %v267_v41 = vmul.f32 0.0078125, %v223_v48  ;;  %v1586_v26 = vld [vmem:[#allocation32_spill] sm:$0xff] }
 0x108   :  { %827 = vst [vmem:[#allocation5 + $0x18] sm:$0xff] %v763_v1   ;;  %v480_v50 = vmul.f32 %v865_v47, %v1582_v5  ;;  %v303_v33 = vmul.f32 %v1390_v52, %v1390_v52  ;;  %876 = vrsqrt.f32 %v422_v22  ;;  %v360_v49 = vmax.f32 %v328_v44, 0.0  ;;  %v867_v34 = vpop.eup %866  ;;  %v1588_v47 = vld [vmem:[#allocation24_spill] sm:$0xff] }
 0x109   :  { %v266_v8 = vmul.f32 0.0078125, %v221_v24  ;;  %v1408_v2 = vmul.f32 0.0078125, %v1583_v37  ;;  %v425_v31 = vadd.f32 1e-05, %v361_v36  ;;  %v331_v54 = vsub.f32 %v267_v41, %v1339_v55  ;;  %v869_v57 = vpop.eup %868  ;;  %v227_v62 = vpop.xlane.xlu1 %226  ;;  %v1589_v24 = vld [vmem:[#allocation25_spill] sm:$0xff] }
 0x10a   :  { %v768_v6 = vpack.c.bf16 %v481_v29, %v480_v50  ;;  %v302_v9 = vmul.f32 %v1396_v23, %v1396_v23  ;;  %v1584_v38 = vsub.f32 %v1016_v10, %v1234_v40  ;;  %v424_v21 = vadd.f32 1e-05, %v360_v49  ;;  %v225_v3 = vpop.xlane.xlu0 %224  ;;  %v1590_v50 = vld [vmem:[#allocation33_spill] sm:$0xff] }
 0x10b   :  { %v330_v51 = vsub.f32 %v266_v8, %v1346_v63  ;;  %v1587_v1 = vsub.f32 %v1585_v60, %v1586_v26  ;;  %878 = vrsqrt.f32 %v425_v31  ;;  %v363_v55 = vmax.f32 %v331_v54, 0.0 }
 0x10c   :  { %v483_v32 = vmul.f32 %v867_v34, %v1584_v38  ;;  %828 = vst [vmem:[#allocation5 + $0x20] sm:$0xff] %v768_v6   ;;  %v269_v59 = vmul.f32 0.0078125, %v227_v62  ;;  %v1421_v7 = vmul.f32 0.0078125, %v1588_v47  ;;  %880 = vrsqrt.f32 %v424_v21  ;;  %v871_v40 = vpop.eup %870  ;;  %v1593_v21 = vld [vmem:[#allocation26_spill] sm:$0xff] }
 0x10d   :  { %v482_v58 = vmul.f32 %v869_v57, %v1587_v1  ;;  %v362_v4 = vmax.f32 %v330_v51, 0.0  ;;  %v268_v10 = vmul.f32 0.0078125, %v225_v3  ;;  %v305_v63 = vmul.f32 %v1408_v2, %v1408_v2  ;;  %v873_v48 = vpop.eup %872  ;;  %v231_v34 = vpop.xlane.xlu1 %230 }
 0x10e   :  { %v427_v22 = vadd.f32 1e-05, %v363_v55  ;;  %v333_v44 = vsub.f32 %v269_v59, %v1373_v53  ;;  %v1427_v5 = vmul.f32 0.0078125, %v1589_v24  ;;  %v1591_v36 = vsub.f32 %v1022_v12, %v1590_v50  ;;  %v229_v37 = vpop.xlane.xlu0 %228 }
 0x10f   :  { %v773_v29 = vpack.c.bf16 %v483_v32, %v482_v58  ;;  %v426_v49 = vadd.f32 1e-05, %v362_v4  ;;  %v332_v8 = vsub.f32 %v268_v10, %v1380_v25  ;;  %v1592_v6 = vsub.f32 %v1024_v13, %v1263_v43 }
 0x110   :  { %v485_v41 = vmul.f32 %v871_v40, %v1591_v36  ;;  %882 = vrsqrt.f32 %v427_v22  ;;  %v365_v53 = vmax.f32 %v333_v44, 0.0  ;;  %v271_v54 = vmul.f32 0.0078125, %v231_v34  ;;  %v1596_v40 = vld [vmem:[#allocation27_spill] sm:$0xff] }
 0x111   :  { %829 = vst [vmem:[#allocation5 + $0x28] sm:$0xff] %v773_v29   ;;  %v484_v31 = vmul.f32 %v873_v48, %v1592_v6  ;;  %v304_v57 = vmul.f32 %v1421_v7, %v1421_v7  ;;  %884 = vrsqrt.f32 %v426_v49  ;;  %v364_v38 = vmax.f32 %v332_v8, 0.0  ;;  %v875_v32 = vpop.eup %874  ;;  %v235_v55 = vpop.xlane.xlu1 %234  ;;  %v1599_v6 = vld [vmem:[#allocation34_spill] sm:$0xff] }
 0x112   :  { %v270_v12 = vmul.f32 0.0078125, %v229_v37  ;;  %v1439_v51 = vmul.f32 0.0078125, %v1593_v21  ;;  %v429_v62 = vadd.f32 1e-05, %v365_v53  ;;  %v335_v3 = vsub.f32 %v271_v54, %v303_v33  ;;  %v877_v60 = vpop.eup %876  ;;  %v233_v59 = vpop.xlane.xlu0 %232 }
 0x113   :  { %v778_v25 = vpack.c.bf16 %v485_v41, %v484_v31  ;;  %v307_v13 = vmul.f32 %v1427_v5, %v1427_v5  ;;  %v1594_v43 = vsub.f32 %v1028_v14, %v1280_v35  ;;  %v428_v1 = vadd.f32 1e-05, %v364_v38  ;;  %v1597_v35 = vld [vmem:[#allocation28_spill] sm:$0xff] }
 0x114   :  { %v334_v58 = vsub.f32 %v270_v12, %v302_v9  ;;  %v1595_v47 = vsub.f32 %v1030_v15, %v1289_v27  ;;  %886 = vrsqrt.f32 %v429_v62  ;;  %v367_v10 = vmax.f32 %v335_v3, 0.0  ;;  %v1601_v3 = vld [vmem:[#allocation29_spill] sm:$0xff] }
 0x115   :  { %v487_v26 = vmul.f32 %v875_v32, %v1594_v43  ;;  %830 = vst [vmem:[#allocation5 + $0x30] sm:$0xff] %v778_v25   ;;  %v273_v33 = vmul.f32 0.0078125, %v235_v55  ;;  %v1450_v29 = vmul.f32 0.0078125, %v1596_v40  ;;  %888 = vrsqrt.f32 %v428_v1  ;;  %v879_v14 = vpop.eup %878  ;;  %v239_v34 = vpop.xlane.xlu1 %238 }
 0x116   :  { %v486_v4 = vmul.f32 %v877_v60, %v1595_v47  ;;  %v366_v22 = vmax.f32 %v334_v58, 0.0  ;;  %v272_v44 = vmul.f32 0.0078125, %v233_v59  ;;  %v1453_v48 = vmul.f32 0.0078125, %v1597_v35  ;;  %v881_v36 = vpop.eup %880  ;;  %v237_v37 = vpop.xlane.xlu0 %236  ;;  %v1602_v47 = vld [vmem:[#allocation30_spill] sm:$0xff] }
 0x117   :  { %v431_v24 = vadd.f32 1e-05, %v367_v10  ;;  %v337_v50 = vsub.f32 %v273_v33, %v305_v63  ;;  %v306_v15 = vmul.f32 %v1439_v51, %v1439_v51  ;;  %v1598_v27 = vsub.f32 %v1034_v16, %v1292_v28 }
 0x118   :  { %v783_v9 = vpack.c.bf16 %v487_v26, %v486_v4  ;;  %v430_v49 = vadd.f32 1e-05, %v366_v22  ;;  %v336_v8 = vsub.f32 %v272_v44, %v304_v57  ;;  %v1600_v31 = vsub.f32 %v1036_v17, %v1599_v6 }
 0x119   :  { %v489_v41 = vmul.f32 %v879_v14, %v1598_v27  ;;  %890 = vrsqrt.f32 %v431_v24  ;;  %v369_v54 = vmax.f32 %v337_v50, 0.0  ;;  %v275_v63 = vmul.f32 0.0078125, %v239_v34  ;;  %v243_v1 = vpop.xlane.xlu1 %242 }
 0x11a   :  { %831 = vst [vmem:[#allocation5 + $0x38] sm:$0xff] %v783_v9   ;;  %v488_v53 = vmul.f32 %v881_v36, %v1600_v31  ;;  %v309_v38 = vmul.f32 %v1450_v29, %v1450_v29  ;;  %892 = vrsqrt.f32 %v430_v49  ;;  %v368_v12 = vmax.f32 %v336_v8, 0.0  ;;  %v883_v16 = vpop.eup %882  ;;  %v241_v58 = vpop.xlane.xlu0 %240 }
 0x11b   :  { %v274_v32 = vmul.f32 0.0078125, %v237_v37  ;;  %v308_v28 = vmul.f32 %v1453_v48, %v1453_v48  ;;  %v433_v21 = vadd.f32 1e-05, %v369_v54  ;;  %v339_v25 = vsub.f32 %v275_v63, %v307_v13  ;;  %v885_v62 = vpop.eup %884 }
 0x11c   :  { %v788_v57 = vpack.c.bf16 %v489_v41, %v488_v53  ;;  %v1468_v17 = vmul.f32 0.0078125, %v1601_v3  ;;  %v491_v60 = vmul.f32 %v883_v16, %v395_v30  ;;  %v432_v43 = vadd.f32 1e-05, %v368_v12  ;;  %v1605_v53 = vld [vmem:[#allocation13_spill] sm:$0xff]  ;;  %v1606_v12 = vld [vmem:[#allocation14_spill] sm:$0xff] }
 0x11d   :  { %v338_v26 = vsub.f32 %v274_v32, %v306_v15  ;;  %v490_v55 = vmul.f32 %v885_v62, %v394_v56  ;;  %894 = vrsqrt.f32 %v433_v21  ;;  %v371_v59 = vmax.f32 %v339_v25, 0.0  ;;  %v247_v9 = vpop.xlane.xlu1 %246  ;;  %v1607_v62 = vld [vmem:[#allocation15_spill] sm:$0xff] }
 0x11e   :  { %832 = vst [vmem:[#allocation5 + $0x40] sm:$0xff] %v788_v57   ;;  %v277_v13 = vmul.f32 0.0078125, %v243_v1  ;;  %v1477_v4 = vmul.f32 0.0078125, %v1602_v47  ;;  %896 = vrsqrt.f32 %v432_v43  ;;  %v276_v33 = vmul.f32 0.0078125, %v241_v58  ;;  %v887_v18 = vpop.eup %886  ;;  %v245_v24 = vpop.xlane.xlu0 %244  ;;  %v1610_v47 = vld [vmem:[#allocation18_spill] sm:$0xff] }
 0x11f   :  { %v370_v10 = vmax.f32 %v338_v26, 0.0  ;;  %v399_v30 = vsub.f32 %v1603_v42, %v1390_v52  ;;  %v793_v40 = vpack.c.bf16 %v491_v60, %v490_v55  ;;  %v435_v22 = vadd.f32 1e-05, %v371_v59  ;;  %v889_v14 = vpop.eup %888  ;;  %v1609_v55 = vld [vmem:[#allocation17_spill] sm:$0xff] }
 0x120   :  { %v341_v44 = vsub.f32 %v277_v13, %v309_v38  ;;  %v311_v19 = vmul.f32 %v1468_v17, %v1468_v17  ;;  %v493_v46 = vmul.f32 %v887_v18, %v397_v61  ;;  %v340_v35 = vsub.f32 %v276_v33, %v308_v28 }
 0x121   :  { %v434_v56 = vadd.f32 1e-05, %v370_v10  ;;  %833 = vst [vmem:[#allocation5 + $0x48] sm:$0xff] %v793_v40   ;;  %v492_v52 = vmul.f32 %v889_v14, %v396_v11  ;;  %898 = vrsqrt.f32 %v435_v22  ;;  %v279_v36 = vmul.f32 0.0078125, %v247_v9  ;;  %v1612_v22 = vld [vmem:[#allocation20_spill] sm:$0xff] }
 0x122   :  { %v373_v50 = vmax.f32 %v341_v44, 0.0  ;;  %v310_v15 = vmul.f32 %v1477_v4, %v1477_v4  ;;  %v372_v27 = vmax.f32 %v340_v35, 0.0  ;;  %v278_v41 = vmul.f32 0.0078125, %v245_v24 }
 0x123   :  { %900 = vrsqrt.f32 %v434_v56  ;;  %v891_v20 = vpop.eup %890  ;;  %v398_v61 = vsub.f32 %v1604_v45, %v1396_v23  ;;  %v798_v49 = vpack.c.bf16 %v493_v46, %v492_v52  ;;  %v343_v34 = vsub.f32 %v279_v36, %v311_v19 }
 0x124   :  { %v437_v8 = vadd.f32 1e-05, %v373_v50  ;;  %v893_v37 = vpop.eup %892  ;;  %v495_v6 = vmul.f32 %v891_v20, %v399_v30  ;;  %v436_v0 = vadd.f32 1e-05, %v372_v27  ;;  %v342_v39 = vsub.f32 %v278_v41, %v310_v15  ;;  %v1611_v30 = vld [vmem:[#allocation19_spill] sm:$0xff] }
 0x125   :  { %834 = vst [vmem:[#allocation5 + $0x50] sm:$0xff] %v798_v49   ;;  %v494_v11 = vmul.f32 %v893_v37, %v398_v61  ;;  %v375_v31 = vmax.f32 %v343_v34, 0.0  ;;  %v401_v54 = vsub.f32 %v1605_v53, %v1408_v2  ;;  %v400_v23 = vsub.f32 %v1606_v12, %v1421_v7  ;;  %v1608_v2 = vld [vmem:[#allocation16_spill] sm:$0xff] }
 0x126   :  { %902 = vrsqrt.f32 %v437_v8  ;;  %v374_v63 = vmax.f32 %v342_v39, 0.0  ;;  %v403_v3 = vsub.f32 %v1607_v62, %v1427_v5  ;;  %v402_v43 = vsub.f32 %v1608_v2, %v1439_v51 }
 0x127   :  { %904 = vrsqrt.f32 %v436_v0  ;;  %v895_v38 = vpop.eup %894  ;;  %v803_v32 = vpack.c.bf16 %v495_v6, %v494_v11  ;;  %v439_v16 = vadd.f32 1e-05, %v375_v31  ;;  %v405_v59 = vsub.f32 %v1609_v55, %v1450_v29 }
 0x128   :  { %v897_v28 = vpop.eup %896  ;;  %v497_v57 = vmul.f32 %v895_v38, %v401_v54  ;;  %v438_v21 = vadd.f32 1e-05, %v374_v63  ;;  %v404_v10 = vsub.f32 %v1610_v47, %v1453_v48  ;;  %v407_v51 = vsub.f32 %v1611_v30, %v1468_v17 }
 0x129   :  { %835 = vst [vmem:[#allocation5 + $0x58] sm:$0xff] %v803_v32   ;;  %v496_v25 = vmul.f32 %v897_v28, %v400_v23  ;;  %906 = vrsqrt.f32 %v439_v16  ;;  %v406_v44 = vsub.f32 %v1612_v22, %v1477_v4 }
 0x12a   :  { %908 = vrsqrt.f32 %v438_v21 }
 0x12b   :  { %v899_v60 = vpop.eup %898  ;;  %v808_v26 = vpack.c.bf16 %v497_v57, %v496_v25 }
 0x12c   :  { %v499_v58 = vmul.f32 %v899_v60, %v403_v3 }
 0x12d   :  { %v901_v1 = vpop.eup %900  ;;  %836 = vst [vmem:[#allocation5 + $0x60] sm:$0xff] %v808_v26  }
 0x12e   :  { %v498_v7 = vmul.f32 %v901_v1, %v402_v43 }
 0x130   :  { %v903_v13 = vpop.eup %902  ;;  %v813_v33 = vpack.c.bf16 %v499_v58, %v498_v7 }
 0x131   :  { %v905_v18 = vpop.eup %904  ;;  %v501_v5 = vmul.f32 %v903_v13, %v405_v59 }
 0x132   :  { %837 = vst [vmem:[#allocation5 + $0x68] sm:$0xff] %v813_v33   ;;  %v500_v42 = vmul.f32 %v905_v18, %v404_v10 }
 0x133   :  { %v907_v40 = vpop.eup %906 }
 0x134   :  { %v818_v14 = vpack.c.bf16 %v501_v5, %v500_v42  ;;  %v909_v29 = vpop.eup %908  ;;  %v503_v19 = vmul.f32 %v907_v40, %v407_v51 }
 0x135   :  { %v502_v46 = vmul.f32 %v909_v29, %v406_v44 }
 0x136   :  { %838 = vst [vmem:[#allocation5 + $0x70] sm:$0xff] %v818_v14  }
 0x137   :  { %v823_v48 = vpack.c.bf16 %v503_v19, %v502_v46 }
 0x139   :  { %839 = vst [vmem:[#allocation5 + $0x78] sm:$0xff] %v823_v48  }
 0x13a   :  { %943 = shalt.err (!%p940_p12)
}
 0x13b   :  { %s944_s24 = scalar_lea.hbm %s1522_s1, 2048 }
 0x13c   :  { %p945_p13 = scmp.ne.s32.totalorder %s1522_s1, %s944_s24  ;;  %p948_p0 = scmp.lt.u32.totalorder %s944_s24, %s1522_s1 }
 0x13e   :  { %p950_p1 = pnand %p948_p0, %p945_p13 }
 0x140   :  { %953 = shalt.err (!%p950_p1)
}
 0x141   :  { %s962_s29 = smov 64   ;;  %s963_s30 = smov 4  }
 0x142   :  { %675 = dma.vmem_to_hbm [thread:$0]  %s670_s20, 2048, %s1522_s1, [#allocation4], %s962_s29, %s962_s29, %s963_s30  }
 0x143   :  { %956 = dma.done.wait [#allocation4], 2048  }
 0x144   :  { %957 = vsyncadd [#allocation4], 4294965248 }
 0x145   :  { %679 = vsyncpa [#allocation3], 1 }
 0x146   :  { %680 = vsyncpa [#allocation4], 1 }

</bundles_post_ra>
